<compile_context>
chip_gen: v7x
topology: tpu7x:2x2x1
jax: 0.10.0
libtpu: 0.0.40
codegen_flags: <defaults>
</compile_context>

<pallas_src>
import functools

import jax
import jax.numpy as jnp
from jax.experimental import pallas as pl
from jax.experimental.pallas import tpu as pltpu


def _patch_merging_kernel(x_ref, w_ref, b_ref, o_ref, *, C, eps):
    """Fused LayerNorm + 2x2/stride-2 conv (as matmuls) for one (batch, row-tile).

    x_ref: (th, 2, Wh, 2C)  raw input rows; dim1 = kh, lanes = (kw, c) packed.
    w_ref: (4C, O)          LN-gamma-folded conv weight, rows ordered (kh, kw, c).
    b_ref: (1, O)           f32 conv bias with LN-beta folded in.
    o_ref: (th*Wh, O)       output tokens for this tile.
    """
    th, _, wh, two_c = x_ref.shape
    tm = th * wh
    f32 = jnp.float32
    inv_c = 1.0 / C

    # Lane mask selecting the kw=0 channel chunk; built once, reused for both kh.
    lane = jax.lax.broadcasted_iota(jnp.int32, (1, two_c), 1)
    chunk0 = lane < C

    acc = None
    for kh in range(2):
        # (th, Wh, 2C) -> (tm, 2C); free when Wh % 8 == 0 (see wrapper note).
        xf = x_ref[:, kh, :, :].reshape(tm, two_c).astype(f32)
        xsq = xf * xf

        # Per-token LayerNorm stats for each C-channel chunk without lane slicing:
        # chunk0 via masked sums, chunk1 = total - chunk0.  One-pass E[x^2]-mu^2 in f32.
        s1_all = jnp.sum(xf, axis=-1, keepdims=True)
        s2_all = jnp.sum(xsq, axis=-1, keepdims=True)
        s1_0 = jnp.sum(jnp.where(chunk0, xf, 0.0), axis=-1, keepdims=True)
        s2_0 = jnp.sum(jnp.where(chunk0, xsq, 0.0), axis=-1, keepdims=True)
        mu0 = s1_0 * inv_c
        mu1 = (s1_all - s1_0) * inv_c
        var0 = jnp.maximum(s2_0 * inv_c - mu0 * mu0, 0.0)
        var1 = jnp.maximum((s2_all - s2_0) * inv_c - mu1 * mu1, 0.0)
        r0 = jax.lax.rsqrt(var0 + eps)                      # EUP
        r1 = jax.lax.rsqrt(var1 + eps)

        mu = jnp.where(chunk0, mu0, mu1)                     # (tm, 2C) broadcast selects
        r = jnp.where(chunk0, r0, r1)
        xn = ((xf - mu) * r).astype(w_ref.dtype)             # LN affine folded into w/b

        # Single K=2C MXU matmul per kh (static, sublane-aligned weight row slice).
        part = jnp.dot(xn, w_ref[kh * two_c:(kh + 1) * two_c, :],
                       preferred_element_type=f32)
        acc = part if acc is None else acc + part

    o_ref[...] = (acc + b_ref[...]).astype(o_ref.dtype)


def _vmem_capacity_bytes():
    try:
        info = pltpu.get_tpu_info()
        cap = getattr(info, "vmem_capacity_bytes", None)
        if cap:
            return int(cap)
    except Exception:
        pass
    return 128 * 1024 * 1024


def _const_spec(shape):
    """BlockSpec for a grid-invariant operand; single-buffered when supported."""
    index_map = lambda b, i: (0,) * len(shape)
    buffered = getattr(pl, "Buffered", None)
    if buffered is not None:
        try:
            return pl.BlockSpec(shape, index_map, pipeline_mode=buffered(1))
        except Exception:
            pass
    return pl.BlockSpec(shape, index_map)


def _pick_block_rows(B, Hh, Wh, C, O, in_item, out_item, budget_bytes, fixed_bytes,
                     max_tokens):
    """Pick th (rows of H//2 per grid step), a divisor of Hh, sized for VMEM."""
    per_row = (2 * (2 * Wh * 2 * C) * in_item      # double-buffered input slab
               + 2 * (Wh * O) * out_item           # double-buffered output block
               + 4 * (Wh * 2 * C) * 4              # f32 LN intermediates
               + 2 * (Wh * O) * 4)                 # f32 matmul partials
    cap = max(1, int((budget_bytes - fixed_bytes) // per_row))
    cap = min(cap, max(1, max_tokens // max(Wh, 1)))
    divs = [d for d in range(1, Hh + 1) if Hh % d == 0]
    fit = [d for d in divs if d <= cap] or [1]
    # Partial output token blocks should be sublane-aligned (full blocks always OK).
    ok = [d for d in fit if d == Hh or (d * Wh) % 8 == 0] or fit

    def score(d):
        steps = B * (Hh // d)
        return (steps >= 2 and steps % 2 == 0,      # even megacore split (v7x)
                (d * Wh) % 8 == 0,                  # aligned token block
                d)                                  # then biggest tile

    return max(ok, key=score)


def patch_merging_forward(x, H, W, params, *, eps=1e-5, use_bf16_mxu=True):
    """x: (B, H*W, C) -> (B, (H//2)*(W//2), 2*C).  patch_size=[2] case."""
    B, L, C = x.shape
    assert L == H * W, "input feature has wrong size"
    assert H % 2 == 0 and W % 2 == 0, f"x size ({H}*{W}) are not even."
    w_flat, bias, gamma, beta = params
    O = w_flat.shape[1]
    Hh, Wh = H // 2, W // 2

    # ---- tiny wrapper-side parameter folding (O(C*O) work) --------------------
    w32 = w_flat.astype(jnp.float32)
    gamma4 = jnp.tile(gamma.reshape(1, C), (1, 4)).reshape(4 * C, 1).astype(jnp.float32)
    beta4 = jnp.tile(beta.reshape(1, C), (1, 4)).astype(jnp.float32)
    w_g = w32 * gamma4                                           # fold LN scale into conv
    bias_eff = bias.reshape(1, O).astype(jnp.float32) + beta4 @ w32   # fold LN shift

    # MXU operand dtype: bf16 fast path (stats/accumulation stay f32); f32 exact path opt-out.
    mxu_dtype = jnp.bfloat16 if (use_bf16_mxu or x.dtype == jnp.bfloat16) else jnp.float32
    w_g = w_g.astype(mxu_dtype)

    # Free, contiguous view (no HBM copy): (B, H//2, kh, W//2, kw*C).
    x5 = x.reshape(B, Hh, 2, Wh, 2 * C)

    in_item = jnp.dtype(x.dtype).itemsize
    out_item = in_item
    w_item = jnp.dtype(mxu_dtype).itemsize

    # ---- generation-aware VMEM sizing -----------------------------------------
    vmem_cap = _vmem_capacity_bytes()
    small_vmem = vmem_cap <= 96 * 1024 * 1024          # v7x-like (64 MiB per TC)
    limit_cap = (32 << 20) if small_vmem else (64 << 20)
    blk_budget = (7 << 20) if small_vmem else (20 << 20)
    max_tokens = 1024 if small_vmem else 2048

    w_bytes = 4 * C * O * w_item
    fixed = 2 * w_bytes + 2 * O * 4                    # weights (conservatively 2x) + bias
    th = _pick_block_rows(B, Hh, Wh, C, O, in_item, out_item, blk_budget, fixed, max_tokens)
    n_i = Hh // th
    TM = th * Wh
    M = B * Hh * Wh

    in_block = th * 2 * Wh * 2 * C * in_item
    out_block = TM * O * out_item
    need = 2 * in_block + 2 * out_block + fixed + (2 << 20)
    vmem_limit = int(min(limit_cap, max(need + (6 << 20), 24 << 20)))
    vmem_limit = int(max(vmem_limit, need + (2 << 20)))

    kernel = functools.partial(_patch_merging_kernel, C=C, eps=eps)
    cost = pl.CostEstimate(
        flops=2 * M * 4 * C * O,
        transcendentals=4 * M,
        bytes_accessed=int(x.size * in_item + w_g.size * w_item + M * O * out_item),
    )

    out = pl.pallas_call(
        kernel,
        out_shape=jax.ShapeDtypeStruct((B, Hh * Wh, O), x.dtype),
        grid=(B, n_i),
        in_specs=[
            pl.BlockSpec((pl.Squeezed(), th, 2, Wh, 2 * C),
                         lambda b, i: (b, i, 0, 0, 0)),        # contiguous input slab
            _const_spec((4 * C, O)),                           # folded conv weight
            _const_spec((1, O)),                               # folded bias
        ],
        out_specs=pl.BlockSpec((pl.Squeezed(), TM, O), lambda b, i: (b, i, 0)),
        compiler_params=pltpu.CompilerParams(
            dimension_semantics=("parallel", "parallel"),
            vmem_limit_bytes=vmem_limit),
        cost_estimate=cost,
    )(x5, w_g, bias_eff)
    return out


def init_params(key, dim):
    """Deterministic synthetic parameters matching PatchMerging(dim, patch_size=[2])."""
    out_dim = 2 * dim  # 2 * dim // 2**0
    k_w, k_b, k_g, k_be = jax.random.split(key, 4)
    # Conv2d weight in torch layout (out_dim, dim, kh, kw); flatten to [(kh,kw,c), o].
    w_torch = 0.1 * jax.random.normal(k_w, (out_dim, dim, 2, 2), dtype=jnp.float32)
    w_flat = jnp.transpose(w_torch, (2, 3, 1, 0)).reshape(4 * dim, out_dim)
    bias = 0.1 * jax.random.normal(k_b, (1, out_dim), dtype=jnp.float32)
    # LayerNorm affine (torch default is ones/zeros; perturb to exercise the path).
    gamma = 1.0 + 0.05 * jax.random.normal(k_g, (1, dim), dtype=jnp.float32)
    beta = 0.05 * jax.random.normal(k_be, (1, dim), dtype=jnp.float32)
    return w_flat, bias, gamma, beta


def reference_forward(x, H, W, params, eps=1e-5):
    """Pure-JAX reference replicating the PyTorch forward."""
    w_flat, bias, gamma, beta = params
    B, L, C = x.shape
    mu = jnp.mean(x, axis=-1, keepdims=True)
    var = jnp.mean((x - mu) ** 2, axis=-1, keepdims=True)
    xn = (x - mu) / jnp.sqrt(var + eps) * gamma + beta
    xp = xn.reshape(B, H // 2, 2, W // 2, 2, C).transpose(0, 1, 3, 2, 4, 5)
    xp = xp.reshape(B, (H // 2) * (W // 2), 4 * C)
    return xp @ w_flat + bias


if __name__ == "__main__":
    B, H, W, dim = 2, 16, 16, 64
    key = jax.random.PRNGKey(0)
    k_x, k_p = jax.random.split(key)
    x = jax.random.normal(k_x, (B, H * W, dim), dtype=jnp.float32)
    params = init_params(k_p, dim)

    ref = reference_forward(x, H, W, params)

    # Default fast path: bf16 MXU operands, f32 LN stats and accumulation.
    out = jax.block_until_ready(patch_merging_forward(x, H, W, params))
    assert out.shape == (B, (H // 2) * (W // 2), 2 * dim), out.shape
    err_bf16 = float(jnp.max(jnp.abs(out.astype(jnp.float32) - ref)))
    assert jnp.allclose(out.astype(jnp.float32), ref, atol=3e-2, rtol=2e-2), err_bf16

    # Exact path: f32 MXU operands, tight tolerance against the reference.
    out32 = jax.block_until_ready(patch_merging_forward(x, H, W, params, use_bf16_mxu=False))
    err_f32 = float(jnp.max(jnp.abs(out32 - ref)))
    assert jnp.allclose(out32, ref, atol=2e-3, rtol=2e-3), err_f32

    print("KERNEL_OK")
</pallas_src>

<mosaic_0001>
module attributes {stable_mosaic.version = 11 : i64} {
  func.func @_patch_merging_kernel(%arg0: i32, %arg1: i32, %arg2: memref<1x8x2x8x128xf32, #tpu.memory_space<vmem>>, %arg3: memref<256x128xbf16, #tpu.memory_space<vmem>>, %arg4: memref<1x128xf32, #tpu.memory_space<vmem>>, %arg5: memref<1x64x128xf32, #tpu.memory_space<vmem>>) attributes {dimension_semantics = [#tpu.dimension_semantics<parallel>, #tpu.dimension_semantics<parallel>], iteration_bounds = array<i64: 2, 1>, scalar_prefetch = 0 : i64, scratch_operands = 0 : i64, tpu.core_type = #tpu.core_type<tc>, window_params = [{transform_indices = @transform_0, window_bounds = array<i64: 1, 8, 2, 8, 128>}, {pipeline_mode = #tpu.pipeline_mode<synchronous>, transform_indices = @transform_1, window_bounds = array<i64: 256, 128>}, {pipeline_mode = #tpu.pipeline_mode<synchronous>, transform_indices = @transform_2, window_bounds = array<i64: 1, 128>}, {transform_indices = @transform_3, window_bounds = array<i64: 1, 64, 128>}]} {
    %0 = tpu.iota {dimensions = array<i32: 1>} : vector<1x128xi32>
    %c64_i32 = arith.constant 64 : i32
    %1 = vector.broadcast %c64_i32 : i32 to vector<1x128xi32>
    %2 = arith.cmpi slt, %0, %1 : vector<1x128xi32>
    %c0 = arith.constant 0 : index
    %c0_0 = arith.constant 0 : index
    %c0_1 = arith.constant 0 : index
    %c0_2 = arith.constant 0 : index
    %c0_3 = arith.constant 0 : index
    %3 = vector.load %arg2[%c0, %c0_0, %c0_1, %c0_2, %c0_3] : memref<1x8x2x8x128xf32, #tpu.memory_space<vmem>>, vector<1x8x1x8x128xf32>
    %4 = vector.shape_cast %3 : vector<1x8x1x8x128xf32> to vector<8x8x128xf32>
    %5 = vector.shape_cast %4 : vector<8x8x128xf32> to vector<64x128xf32>
    %6 = arith.mulf %5, %5 : vector<64x128xf32>
    %cst = arith.constant dense<0.000000e+00> : vector<64xf32>
    %7 = vector.multi_reduction <add>, %5, %cst [1] : vector<64x128xf32> to vector<64xf32>
    %8 = vector.shape_cast %7 : vector<64xf32> to vector<64x1xf32>
    %cst_4 = arith.constant dense<0.000000e+00> : vector<64xf32>
    %9 = vector.multi_reduction <add>, %6, %cst_4 [1] : vector<64x128xf32> to vector<64xf32>
    %10 = vector.shape_cast %9 : vector<64xf32> to vector<64x1xf32>
    %cst_5 = arith.constant 0.000000e+00 : f32
    %11 = vector.shape_cast %2 : vector<1x128xi1> to vector<1x128xi1>
    %12 = vector.broadcast %11 : vector<1x128xi1> to vector<64x128xi1>
    %13 = vector.broadcast %cst_5 : f32 to vector<64x128xf32>
    %14 = arith.select %12, %5, %13 : vector<64x128xi1>, vector<64x128xf32>
    %cst_6 = arith.constant dense<0.000000e+00> : vector<64xf32>
    %15 = vector.multi_reduction <add>, %14, %cst_6 [1] : vector<64x128xf32> to vector<64xf32>
    %16 = vector.shape_cast %15 : vector<64xf32> to vector<64x1xf32>
    %cst_7 = arith.constant 0.000000e+00 : f32
    %17 = vector.shape_cast %2 : vector<1x128xi1> to vector<1x128xi1>
    %18 = vector.broadcast %17 : vector<1x128xi1> to vector<64x128xi1>
    %19 = vector.broadcast %cst_7 : f32 to vector<64x128xf32>
    %20 = arith.select %18, %6, %19 : vector<64x128xi1>, vector<64x128xf32>
    %cst_8 = arith.constant dense<0.000000e+00> : vector<64xf32>
    %21 = vector.multi_reduction <add>, %20, %cst_8 [1] : vector<64x128xf32> to vector<64xf32>
    %22 = vector.shape_cast %21 : vector<64xf32> to vector<64x1xf32>
    %cst_9 = arith.constant 1.562500e-02 : f32
    %23 = vector.broadcast %cst_9 : f32 to vector<64x1xf32>
    %24 = arith.mulf %16, %23 : vector<64x1xf32>
    %25 = arith.subf %8, %16 : vector<64x1xf32>
    %cst_10 = arith.constant 1.562500e-02 : f32
    %26 = vector.broadcast %cst_10 : f32 to vector<64x1xf32>
    %27 = arith.mulf %25, %26 : vector<64x1xf32>
    %cst_11 = arith.constant 1.562500e-02 : f32
    %28 = vector.broadcast %cst_11 : f32 to vector<64x1xf32>
    %29 = arith.mulf %22, %28 : vector<64x1xf32>
    %30 = arith.mulf %24, %24 : vector<64x1xf32>
    %31 = arith.subf %29, %30 : vector<64x1xf32>
    %cst_12 = arith.constant 0.000000e+00 : f32
    %32 = vector.broadcast %cst_12 : f32 to vector<64x1xf32>
    %33 = arith.maximumf %31, %32 : vector<64x1xf32>
    %34 = arith.subf %10, %22 : vector<64x1xf32>
    %cst_13 = arith.constant 1.562500e-02 : f32
    %35 = vector.broadcast %cst_13 : f32 to vector<64x1xf32>
    %36 = arith.mulf %34, %35 : vector<64x1xf32>
    %37 = arith.mulf %27, %27 : vector<64x1xf32>
    %38 = arith.subf %36, %37 : vector<64x1xf32>
    %cst_14 = arith.constant 0.000000e+00 : f32
    %39 = vector.broadcast %cst_14 : f32 to vector<64x1xf32>
    %40 = arith.maximumf %38, %39 : vector<64x1xf32>
    %cst_15 = arith.constant 9.99999974E-6 : f32
    %41 = vector.broadcast %cst_15 : f32 to vector<64x1xf32>
    %42 = arith.addf %33, %41 : vector<64x1xf32>
    %43 = math.rsqrt %42 : vector<64x1xf32>
    %cst_16 = arith.constant 9.99999974E-6 : f32
    %44 = vector.broadcast %cst_16 : f32 to vector<64x1xf32>
    %45 = arith.addf %40, %44 : vector<64x1xf32>
    %46 = math.rsqrt %45 : vector<64x1xf32>
    %47 = vector.shape_cast %2 : vector<1x128xi1> to vector<1x128xi1>
    %48 = vector.broadcast %47 : vector<1x128xi1> to vector<64x128xi1>
    %49 = vector.shape_cast %24 : vector<64x1xf32> to vector<64x1xf32>
    %50 = vector.broadcast %49 : vector<64x1xf32> to vector<64x128xf32>
    %51 = vector.shape_cast %27 : vector<64x1xf32> to vector<64x1xf32>
    %52 = vector.broadcast %51 : vector<64x1xf32> to vector<64x128xf32>
    %53 = arith.select %48, %50, %52 : vector<64x128xi1>, vector<64x128xf32>
    %54 = vector.shape_cast %2 : vector<1x128xi1> to vector<1x128xi1>
    %55 = vector.broadcast %54 : vector<1x128xi1> to vector<64x128xi1>
    %56 = vector.shape_cast %43 : vector<64x1xf32> to vector<64x1xf32>
    %57 = vector.broadcast %56 : vector<64x1xf32> to vector<64x128xf32>
    %58 = vector.shape_cast %46 : vector<64x1xf32> to vector<64x1xf32>
    %59 = vector.broadcast %58 : vector<64x1xf32> to vector<64x128xf32>
    %60 = arith.select %55, %57, %59 : vector<64x128xi1>, vector<64x128xf32>
    %61 = arith.subf %5, %53 : vector<64x128xf32>
    %62 = arith.mulf %61, %60 : vector<64x128xf32>
    %63 = arith.truncf %62 : vector<64x128xf32> to vector<64x128xbf16>
    %c0_17 = arith.constant 0 : index
    %c0_18 = arith.constant 0 : index
    %64 = vector.load %arg3[%c0_17, %c0_18] : memref<256x128xbf16, #tpu.memory_space<vmem>>, vector<128x128xbf16>
    %cst_19 = arith.constant dense<0.000000e+00> : vector<64x128xf32>
    %65 = tpu.matmul %63, %64, %cst_19 {dimension_numbers = #tpu.dot_dimension_numbers<[1], [0], [0], [1], [0, 0, 1, 1], [], []>} : vector<64x128xbf16>, vector<128x128xbf16>, vector<64x128xf32> -> vector<64x128xf32>
    %c0_20 = arith.constant 0 : index
    %c0_21 = arith.constant 0 : index
    %c1 = arith.constant 1 : index
    %c0_22 = arith.constant 0 : index
    %c0_23 = arith.constant 0 : index
    %66 = vector.load %arg2[%c0_20, %c0_21, %c1, %c0_22, %c0_23] : memref<1x8x2x8x128xf32, #tpu.memory_space<vmem>>, vector<1x8x1x8x128xf32>
    %67 = vector.shape_cast %66 : vector<1x8x1x8x128xf32> to vector<8x8x128xf32>
    %68 = vector.shape_cast %67 : vector<8x8x128xf32> to vector<64x128xf32>
    %69 = arith.mulf %68, %68 : vector<64x128xf32>
    %cst_24 = arith.constant dense<0.000000e+00> : vector<64xf32>
    %70 = vector.multi_reduction <add>, %68, %cst_24 [1] : vector<64x128xf32> to vector<64xf32>
    %71 = vector.shape_cast %70 : vector<64xf32> to vector<64x1xf32>
    %cst_25 = arith.constant dense<0.000000e+00> : vector<64xf32>
    %72 = vector.multi_reduction <add>, %69, %cst_25 [1] : vector<64x128xf32> to vector<64xf32>
    %73 = vector.shape_cast %72 : vector<64xf32> to vector<64x1xf32>
    %cst_26 = arith.constant 0.000000e+00 : f32
    %74 = vector.shape_cast %2 : vector<1x128xi1> to vector<1x128xi1>
    %75 = vector.broadcast %74 : vector<1x128xi1> to vector<64x128xi1>
    %76 = vector.broadcast %cst_26 : f32 to vector<64x128xf32>
    %77 = arith.select %75, %68, %76 : vector<64x128xi1>, vector<64x128xf32>
    %cst_27 = arith.constant dense<0.000000e+00> : vector<64xf32>
    %78 = vector.multi_reduction <add>, %77, %cst_27 [1] : vector<64x128xf32> to vector<64xf32>
    %79 = vector.shape_cast %78 : vector<64xf32> to vector<64x1xf32>
    %cst_28 = arith.constant 0.000000e+00 : f32
    %80 = vector.shape_cast %2 : vector<1x128xi1> to vector<1x128xi1>
    %81 = vector.broadcast %80 : vector<1x128xi1> to vector<64x128xi1>
    %82 = vector.broadcast %cst_28 : f32 to vector<64x128xf32>
    %83 = arith.select %81, %69, %82 : vector<64x128xi1>, vector<64x128xf32>
    %cst_29 = arith.constant dense<0.000000e+00> : vector<64xf32>
    %84 = vector.multi_reduction <add>, %83, %cst_29 [1] : vector<64x128xf32> to vector<64xf32>
    %85 = vector.shape_cast %84 : vector<64xf32> to vector<64x1xf32>
    %cst_30 = arith.constant 1.562500e-02 : f32
    %86 = vector.broadcast %cst_30 : f32 to vector<64x1xf32>
    %87 = arith.mulf %79, %86 : vector<64x1xf32>
    %88 = arith.subf %71, %79 : vector<64x1xf32>
    %cst_31 = arith.constant 1.562500e-02 : f32
    %89 = vector.broadcast %cst_31 : f32 to vector<64x1xf32>
    %90 = arith.mulf %88, %89 : vector<64x1xf32>
    %cst_32 = arith.constant 1.562500e-02 : f32
    %91 = vector.broadcast %cst_32 : f32 to vector<64x1xf32>
    %92 = arith.mulf %85, %91 : vector<64x1xf32>
    %93 = arith.mulf %87, %87 : vector<64x1xf32>
    %94 = arith.subf %92, %93 : vector<64x1xf32>
    %cst_33 = arith.constant 0.000000e+00 : f32
    %95 = vector.broadcast %cst_33 : f32 to vector<64x1xf32>
    %96 = arith.maximumf %94, %95 : vector<64x1xf32>
    %97 = arith.subf %73, %85 : vector<64x1xf32>
    %cst_34 = arith.constant 1.562500e-02 : f32
    %98 = vector.broadcast %cst_34 : f32 to vector<64x1xf32>
    %99 = arith.mulf %97, %98 : vector<64x1xf32>
    %100 = arith.mulf %90, %90 : vector<64x1xf32>
    %101 = arith.subf %99, %100 : vector<64x1xf32>
    %cst_35 = arith.constant 0.000000e+00 : f32
    %102 = vector.broadcast %cst_35 : f32 to vector<64x1xf32>
    %103 = arith.maximumf %101, %102 : vector<64x1xf32>
    %cst_36 = arith.constant 9.99999974E-6 : f32
    %104 = vector.broadcast %cst_36 : f32 to vector<64x1xf32>
    %105 = arith.addf %96, %104 : vector<64x1xf32>
    %106 = math.rsqrt %105 : vector<64x1xf32>
    %cst_37 = arith.constant 9.99999974E-6 : f32
    %107 = vector.broadcast %cst_37 : f32 to vector<64x1xf32>
    %108 = arith.addf %103, %107 : vector<64x1xf32>
    %109 = math.rsqrt %108 : vector<64x1xf32>
    %110 = vector.shape_cast %2 : vector<1x128xi1> to vector<1x128xi1>
    %111 = vector.broadcast %110 : vector<1x128xi1> to vector<64x128xi1>
    %112 = vector.shape_cast %87 : vector<64x1xf32> to vector<64x1xf32>
    %113 = vector.broadcast %112 : vector<64x1xf32> to vector<64x128xf32>
    %114 = vector.shape_cast %90 : vector<64x1xf32> to vector<64x1xf32>
    %115 = vector.broadcast %114 : vector<64x1xf32> to vector<64x128xf32>
    %116 = arith.select %111, %113, %115 : vector<64x128xi1>, vector<64x128xf32>
    %117 = vector.shape_cast %2 : vector<1x128xi1> to vector<1x128xi1>
    %118 = vector.broadcast %117 : vector<1x128xi1> to vector<64x128xi1>
    %119 = vector.shape_cast %106 : vector<64x1xf32> to vector<64x1xf32>
    %120 = vector.broadcast %119 : vector<64x1xf32> to vector<64x128xf32>
    %121 = vector.shape_cast %109 : vector<64x1xf32> to vector<64x1xf32>
    %122 = vector.broadcast %121 : vector<64x1xf32> to vector<64x128xf32>
    %123 = arith.select %118, %120, %122 : vector<64x128xi1>, vector<64x128xf32>
    %124 = arith.subf %68, %116 : vector<64x128xf32>
    %125 = arith.mulf %124, %123 : vector<64x128xf32>
    %126 = arith.truncf %125 : vector<64x128xf32> to vector<64x128xbf16>
    %c128 = arith.constant 128 : index
    %c0_38 = arith.constant 0 : index
    %127 = vector.load %arg3[%c128, %c0_38] : memref<256x128xbf16, #tpu.memory_space<vmem>>, vector<128x128xbf16>
    %cst_39 = arith.constant dense<0.000000e+00> : vector<64x128xf32>
    %128 = tpu.matmul %126, %127, %cst_39 {dimension_numbers = #tpu.dot_dimension_numbers<[1], [0], [0], [1], [0, 0, 1, 1], [], []>} : vector<64x128xbf16>, vector<128x128xbf16>, vector<64x128xf32> -> vector<64x128xf32>
    %129 = arith.addf %65, %128 : vector<64x128xf32>
    %c0_40 = arith.constant 0 : index
    %c0_41 = arith.constant 0 : index
    %130 = vector.load %arg4[%c0_40, %c0_41] : memref<1x128xf32, #tpu.memory_space<vmem>>, vector<1x128xf32>
    %131 = vector.broadcast %130 : vector<1x128xf32> to vector<64x128xf32>
    %132 = arith.addf %129, %131 : vector<64x128xf32>
    %c0_42 = arith.constant 0 : index
    %c0_43 = arith.constant 0 : index
    %c0_44 = arith.constant 0 : index
    %133 = vector.load %arg5[%c0_42, %c0_43, %c0_44] : memref<1x64x128xf32, #tpu.memory_space<vmem>>, vector<1x64x128xf32>
    %134 = vector.shape_cast %133 : vector<1x64x128xf32> to vector<64x128xf32>
    %135 = vector.shape_cast %132 : vector<64x128xf32> to vector<1x64x128xf32>
    tpu.vector_store %arg5[%c0_42, %c0_43, %c0_44], %135 {strides = array<i32>} : memref<1x64x128xf32, #tpu.memory_space<vmem>>, vector<1x64x128xf32>,
    return
  }
  func.func @transform_0(%arg0: i32, %arg1: i32) -> (i32, i32, i32, i32, i32) {
    %c0_i32 = arith.constant 0 : i32
    %c0_i32_0 = arith.constant 0 : i32
    %c0_i32_1 = arith.constant 0 : i32
    %c0_i32_2 = arith.constant 0 : i32
    return %arg0, %arg1, %c0_i32, %c0_i32_0, %c0_i32_1 : i32, i32, i32, i32, i32
  }
  func.func @transform_1(%arg0: i32, %arg1: i32) -> (i32, i32) {
    %c0_i32 = arith.constant 0 : i32
    %c0_i32_0 = arith.constant 0 : i32
    %c0_i32_1 = arith.constant 0 : i32
    return %c0_i32, %c0_i32_0 : i32, i32
  }
  func.func @transform_2(%arg0: i32, %arg1: i32) -> (i32, i32) {
    %c0_i32 = arith.constant 0 : i32
    %c0_i32_0 = arith.constant 0 : i32
    %c0_i32_1 = arith.constant 0 : i32
    return %c0_i32, %c0_i32_0 : i32, i32
  }
  func.func @transform_3(%arg0: i32, %arg1: i32) -> (i32, i32, i32) {
    %c0_i32 = arith.constant 0 : i32
    %c0_i32_0 = arith.constant 0 : i32
    return %arg0, %arg1, %c0_i32 : i32, i32, i32
  }
}

</mosaic_0001>

<bundles_post_ra>
// kernel: tpu_custom_call.1
= control target key start
LH: loop header
LB: loop body
LE: loop exit
PB: predicated region body
PF: predicated region fallthrough
CT: control target
= control target key end

     0   :  { %8 = vsyncpa [#allocation3], 0  ;;  %s2269_s0 = inlined_call_operand.hbm [shape: f32[2,8,2,8,128], index: 0, kind: input, shape index: {}]   ;;  %s2270_s1 = inlined_call_operand.hbm [shape: bf16[256,128], index: 1, kind: input, shape index: {}]   ;;  %s2271_s2 = inlined_call_operand.vmem [shape: f32[1,128], index: 2, kind: input, shape index: {}]   ;;  %s2272_s3 = inlined_call_operand.hbm [shape: f32[2,64,128], index: 3, kind: output, shape index: {}]  }
   0x1   :  { %10 = vsyncpa [#allocation3 + $0x1], 0 }
   0x2   :  { %11 = vsyncpa [#allocation6], 0 }
   0x3   :  { %12 = vsyncpa [#allocation4], 0 }
   0x4   :  { %14 = vsyncpa [#allocation4 + $0x1], 0  ;;  %s1604_s12 = smov 0   ;;  %s1606_s13 = smov 0  }
   0x5   :  { %s1608_s14 = smov 0   ;;  %s1610_s15 = smov 0  }
   0x6   :  { %s1612_s16 = smov 0   ;;  %s1614_s17 = smov 0  }
   0x7 LB: > { %s1146_s18 = sadd.s32 4294967295, %s1573_s17   ;;  %s1147_s19 = sadd.s32 4294967294, %s1573_s17   ;;  %s1573_s17 = sphi %s1614_s17, %s20_s17   ;;  %s1569_s16 = sphi %s1612_s16, %s2296_s16   ;;  %s1565_s15 = sphi %s1610_s15, %s2295_s15   ;;  %s1561_s14 = sphi %s1608_s14, %s2294_s14   ;;  %s1557_s13 = sphi %s1606_s13, %s2293_s13   ;;  %s1553_s12 = sphi %s1604_s12, %s2292_s12  }
   0x8   : > { %p54_p0 = scmp.ne.s32.totalorder %s1557_s13, %s1553_s12  ;;  %p1638_p1 = scmp.eq.s32.totalorder %s1146_s18, 0 }
   0x9   : > { %p1642_p2 = scmp.eq.s32.totalorder %s1146_s18, 1  ;;  %p128_p3 = scmp.eq.s32.totalorder %s1147_s19, 1 }
   0xa   : > { %s2277_s20 = scalar_select %p1638_p1, 1, 0 }
   0xb   : > { %s2278_s21 = scalar_select %p1642_p2, 1, 0 }
   0xc   : > { %p1648_p4 = por %p1638_p1, %p54_p0  ;;  %p1148_p5 = scmp.ge.s32.totalorder %s1573_s17, 1 }
   0xd   : > { %p1653_p6 = por %p128_p3, %p54_p0  ;;  %p135_p7 = scmp.lt.s32.totalorder %s1573_s17, 3 }
   0xe   : > { %s2279_s22 = scalar_select %p1648_p4, 1, 0 }
   0xf   : > { %s2280_s23 = scalar_select %p1653_p6, 1, 0 }
  0x10   : > { %p1658_p8 = pnand %p1148_p5, %p135_p7  ;;  %s1575_s25 = smov [#allocation5]  }
  0x11   : > { %s147_s26 = sshll.u32 %s1575_s25, 4  ;;  %s32_s28 = sadd.s32 1, %s1569_s16  ;;  %s148_s26 = int_to_ptr.vmem [resolvable:$true] %s147_s26 }
  0x12   : > { %s2281_s24 = scalar_select %p1658_p8, 1, 0 }
  0x13   : > { %p1278_p9 = pneg %p1658_p8  ;;  %s1429_s4 = scalar_lea.hbm %s2270_s1, 2048 }
  0x14   : > { %p1430_p12 = scmp.ne.s32.totalorder %s2270_s1, %s1429_s4  ;;  %p1436_p5 = scmp.lt.u32.totalorder %s1429_s4, %s2270_s1 }
  0x15   : > { %p1667_p11 = pnand %p1278_p9, %p1638_p1 }
  0x17   : > { %p1431_p13 = pneg %p1667_p11 }
  0x19   : > { %p1432_p0 = pnand %p1431_p13, %p1430_p12 }
  0x1b   : > { %p1433_p3 = pneg %p1432_p0 }
  0x1d   : > { %p1438_p7 = pnand %p1436_p5, %p1433_p3 }
  0x1f   : > { %1441 = shalt.err (!%p1438_p7)
}
  0x20   : > { %s1442_s9 = scalar_lea.vmem %s148_s26, 2048  ;;  %p1450_p1 = scmp.lt.s32.totalorder %s148_s26, %s148_s26 }
  0x21   : > { %p1443_p9 = scmp.ne.s32.totalorder %s148_s26, %s1442_s9  ;;  %p1451_p4 = scmp.lt.s32.totalorder %s1442_s9, %s1442_s9 }
  0x23   : > { %p1445_p10 = pnand %p1443_p9, %p1431_p13  ;;  %p1452_p8 = por %p1451_p4, %p1450_p1 }
  0x25   : > { %p1446_p6 = pneg %p1445_p10 }
  0x27   : > { %p1453_p2 = pnand %p1452_p8, %p1446_p6 }
  0x29   : > { %1456 = shalt.err (!%p1453_p2)
}
  0x2a   : > { %s1576_s10 = smov 64   ;;  %s1577_s11 = smov 4  }
  0x2b   : > { %1281 = dma.hbm_to_vmem [thread:$0]  (!%p1667_p11), %s2270_s1, 2048, %s148_s26, [#allocation6], %s1576_s10, %s1576_s10, %s1577_s11  }
  0x2c   : > { %p34_p1 = scmp.ge.s32.totalorder %s32_s28, 2  ;;  %s41_s25 = sadd.s32 1, %s1561_s14 }
  0x2d   : > { %p48_p2 = scmp.ne.s32.totalorder %s1561_s14, %s1557_s13  ;;  %p49_p4 = scmp.eq.s32.totalorder %s1573_s17, 0 }
  0x2e   : > { %s2298_s28 = smov (%p34_p1, %s32_s28), 0  ;;  %p2284_p8 = scmp.ne.s32.totalorder %s2278_s21, 0 }
  0x2f   : > { %p1694_p6 = por %p49_p4, %p48_p2  ;;  %s36_s27 = ssub.s32 %s1569_s16, %s2298_s28 }
  0x30   : > { %p1700_p10 = por %p2284_p8, %p48_p2  ;;  %p1291_p12 = scmp.lt.s32.totalorder %s1573_s17, 2 }
  0x31   : > { %p39_p11 = scmp.eq.s32.totalorder %s36_s27, 0  ;;  %s164_s26 = sand.u32 1, %s1561_s14  }
  0x32   : > { %s1151_s4 = sshll.u32 %s164_s26, 7  ;;  %s1188_s6 = sshll.u32 %s1569_s16, 11 }
  0x33   : > { %s1709_s5 = scalar_select %p39_p11, %s1561_s14, %s41_s25  }
  0x34   : > { %s1715_s9 = scalar_lea.hbm %s2269_s0, %s1188_s6  ;;  %s168_s21 = scalar_lea.vmem [#allocation2], %s1151_s4 }
  0x35   : > { %s178_s10 = sshll.u32 %s168_s21, 4  ;;  %p1721_p13 = pnand %p1291_p12, %p1694_p6  ;;  %s1717_s10 = int_to_ptr.vmem [resolvable:$true] %s178_s10 }
  0x36   : > { %s1725_s18 = scalar_lea.sflag [#allocation3], %s164_s26  ;;  %s1457_s19 = scalar_lea.hbm %s1715_s9, 2048 }
  0x37   : > { %p1458_p0 = scmp.ne.s32.totalorder %s1715_s9, %s1457_s19  ;;  %p1459_p3 = pneg %p1721_p13 }
  0x38   : > { %s1462_s29 = scalar_lea.hbm %s2269_s0, 4096  ;;  %p1463_p9 = scmp.lt.u32.totalorder %s1715_s9, %s2269_s0 }
  0x39   : > { %p1460_p5 = pnand %p1459_p3, %p1458_p0  ;;  %p1464_p1 = scmp.lt.u32.totalorder %s1462_s29, %s1457_s19 }
  0x3a   : > { %p1466_p4 = scmp.lt.u32.totalorder %s1457_s19, %s1715_s9 }
  0x3b   : > { %p1461_p7 = pneg %p1460_p5  ;;  %p1465_p2 = por %p1464_p1, %p1463_p9 }
  0x3d   : > { %p1467_p6 = por %p1466_p4, %p1465_p2 }
  0x3f   : > { %p1468_p8 = pnand %p1467_p6, %p1461_p7 }
  0x41   : > { %1471 = shalt.err (!%p1468_p8)
}
  0x42   : > { %s1472_s26 = scalar_lea.vmem %s1717_s10, 2048  ;;  %s1578_s7 = smov [#allocation2]  }
  0x43   : > { %p1473_p12 = scmp.ne.s32.totalorder %s1717_s10, %s1472_s26  ;;  %s1477_s8 = sshll.u32 %s1578_s7, 4  ;;  %s1478_s8 = int_to_ptr.vmem [resolvable:$false] %s1477_s8 }
  0x44   : > { %s1479_s21 = scalar_lea.vmem %s1478_s8, 4096  ;;  %p1480_p5 = scmp.lt.s32.totalorder %s1717_s10, %s1478_s8 }
  0x45   : > { %p1475_p11 = pnand %p1473_p12, %p1459_p3  ;;  %p1481_p9 = scmp.lt.s32.totalorder %s1479_s21, %s1472_s26 }
  0x47   : > { %p1476_p0 = pneg %p1475_p11  ;;  %p1482_p1 = por %p1481_p9, %p1480_p5 }
  0x49   : > { %p1483_p2 = pnand %p1482_p1, %p1476_p0 }
  0x4b   : > { %1486 = shalt.err (!%p1483_p2)
}
  0x4c   : > { %s1579_s19 = smov 128   ;;  %s1580_s25 = smov 8  }
  0x4d   : > { %1285 = dma.hbm_to_vmem [thread:$0]  (!%p1721_p13), %s1715_s9, 2048, %s1717_s10, %s1725_s18, %s1579_s19, %s1579_s19, %s1580_s25  }
  0x4e   : > { %p2287_p3 = scmp.ne.s32.totalorder %s2281_s24, 0 }
  0x4f   : > { %s1756_s27 = sand.u32 (!%p2287_p3), 1, %s1557_s13   ;;  %p2288_p7 = scmp.ne.s32.totalorder (!%p2287_p3), %s2279_s22, 0 }
  0x50   : > { %190 = sbr.rel (%p2287_p3) target bundleno = 620 (0x26c), region = 32  ;;  %s1155_s29 = sshll.u32 (!%p2287_p3), %s1756_s27, 7 }
  0x51   : > { %s193_s4 = scalar_lea.sflag (!%p2287_p3), [#allocation3], %s1756_s27  ;;  %s1760_s6 = scalar_lea.vmem (!%p2287_p3), [#allocation2], %s1155_s29 }
  0x57   : > { %1540 = dma.done.wait (%p2288_p7), %s193_s4, 2048  }
  0x58   : > { %1542 = vsyncadd (%p2288_p7), %s193_s4, 4294965248  ;;  %p2289_p13 = scmp.ne.s32.totalorder %s2277_s20, 0 }
  0x5a   : > { %1544 = dma.done.wait (%p2289_p13), [#allocation6], 2048  }
  0x5b   : > { %1546 = vsyncadd (%p2289_p13), [#allocation6], 4294965248  ;;  %v226_v0 = vlaneseq  ;;  %v1774_v2 = vld [vmem:[%s1760_s6 + $0x18] sm:$0xff]  ;;  %v1777_v3 = vld [vmem:[%s1760_s6] sm:$0xff]  ;;  %s1157_s20 = sshll.u32 %s1756_s27, 6  ;;  %s1189_s11 = sshll.u32 %s1565_s15, 10 }
  0x5c   : > { %526 = vadd.xlane.f32.xlu1 %v1774_v2  ;;  %245 = vadd.xlane.f32.xlu0 %v1777_v3  ;;  %v1782_v4 = vld [vmem:[%s1760_s6 + $0x10] sm:$0xff]  ;;  %v1789_v6 = vld [vmem:[%s1760_s6 + $0x8] sm:$0xff]  ;;  %v1802_v10 = vld [vmem:[%s1760_s6 + $0x20] sm:$0xff]  ;;  %v237_v19 = vmul.f32 %v1777_v3, %v1777_v3  ;;  %v517_v22 = vmul.f32 %v1774_v2, %v1774_v2  ;;  %s222_s9 = scalar_lea.vmem [#allocation7], %s1157_s20  ;;  %s2220_s7 = scalar_lea.hbm %s2272_s3, %s1189_s11 }
  0x5d   : > { %v1770_v1 = vand.u32 127, %v226_v0  ;;  %v1805_v11 = vld [vmem:[%s1760_s6 + $0x30] sm:$0xff]  ;;  %v1816_v14 = vld [vmem:[%s1760_s6 + $0x28] sm:$0xff]  ;;  %v1819_v15 = vld [vmem:[%s1760_s6 + $0x38] sm:$0xff]  ;;  %v238_v18 = vmul.f32 %v1782_v4, %v1782_v4  ;;  %v516_v23 = vmul.f32 %v1789_v6, %v1789_v6  ;;  %v239_v27 = vmul.f32 %v1802_v10, %v1802_v10  ;;  %s1049_s10 = sshll.u32 %s222_s9, 4  ;;  %s1034_s15 = scalar_lea.sflag [#allocation4], %s1756_s27  ;;  %s2215_s10 = int_to_ptr.vmem [resolvable:$true] %s1049_s10 }
  0x5e   : > { %v240_v26 = vmul.f32 %v1805_v11, %v1805_v11  ;;  %v519_v30 = vmul.f32 %v1819_v15, %v1819_v15  ;;  %v518_v31 = vmul.f32 %v1816_v14, %v1816_v14  ;;  %v1349_v34 = vld [vmem:[#allocation5] sm:$0xff]   ;;  %v1862_v35 = vld [vmem:[%s1760_s6 + $0x50] sm:$0xff]  ;;  %v1350_v37 = vld [vmem:[#allocation5 + $0x8] sm:$0xff]   ;;  %s1487_s8 = scalar_lea.vmem %s2215_s10, 1024  ;;  %s1581_s21 = smov [#allocation7]  }
  0x5f   : > { %vm228_vm0 = vcmp.lt.s32.totalorder %v1770_v1, 64  ;;  %v1865_v36 = vld [vmem:[%s1760_s6 + $0x40] sm:$0xff]  ;;  %1238 = vmatprep.subr.bf16.mxu0 %v1349_v34  ;;  %v1352_v41 = vld [vmem:[#allocation5 + $0x10] sm:$0xff]   ;;  %v1876_v42 = vld [vmem:[%s1760_s6 + $0x58] sm:$0xff]  ;;  %v242_v0 = vmul.f32 %v1862_v35, %v1862_v35  ;;  %p1488_p4 = scmp.ne.s32.totalorder %s2215_s10, %s1487_s8  ;;  %s1491_s19 = sshll.u32 %s1581_s21, 4  ;;  %s1492_s19 = int_to_ptr.vmem [resolvable:$false] %s1491_s19 }
  0x60   : > { %v279_v5 = vsel %vm228_vm0, %v1777_v3, 0.0  ;;  %247 = vadd.xlane.f32.xlu0 %v1782_v4  ;;  %v280_v7 = vsel %vm228_vm0, %v1782_v4, 0.0  ;;  %v556_v8 = vsel %vm228_vm0, %v1789_v6, 0.0  ;;  %v557_v9 = vsel %vm228_vm0, %v1774_v2, 0.0  ;;  %1239 = vmatpush3.bf16.msra.mxu0 %v1349_v34  ;;  %v1351_v40 = vld [vmem:[#allocation5 + $0x40] sm:$0xff]   ;;  %v1879_v43 = vld [vmem:[%s1760_s6 + $0x48] sm:$0xff]  ;;  %p1494_p12 = scmp.lt.s32.totalorder %s2215_s10, %s1492_s19 }
  0x61   : > { %287 = vadd.xlane.f32.xlu1 %v279_v5  ;;  %v281_v12 = vsel %vm228_vm0, %v1802_v10, 0.0  ;;  %v282_v13 = vsel %vm228_vm0, %v1805_v11, 0.0  ;;  %v558_v16 = vsel %vm228_vm0, %v1816_v14, 0.0  ;;  %v559_v17 = vsel %vm228_vm0, %v1819_v15, 0.0  ;;  %1240 = vmatprep.subr.bf16.mxu0 %v1350_v37  ;;  %v1353_v44 = vld [vmem:[#allocation5 + $0x48] sm:$0xff]   ;;  %v1354_v45 = vld [vmem:[#allocation5 + $0x18] sm:$0xff]   ;;  %p1489_p6 = pnand %p1488_p4, %p1700_p10 }
  0x62   : > { %v304_v20 = vsel %vm228_vm0, %v238_v18, 0.0  ;;  %v303_v21 = vsel %vm228_vm0, %v237_v19, 0.0  ;;  %v581_v24 = vsel %vm228_vm0, %v517_v22, 0.0  ;;  %v580_v25 = vsel %vm228_vm0, %v516_v23, 0.0  ;;  %1214 = vmatprep.subr.bf16.mxu1 %v1351_v40  ;;  %v1355_v48 = vld [vmem:[#allocation5 + $0x50] sm:$0xff]   ;;  %v1356_v49 = vld [vmem:[#allocation5 + $0x20] sm:$0xff]  }
  0x63   : > { %v306_v28 = vsel %vm228_vm0, %v240_v26, 0.0  ;;  %v305_v29 = vsel %vm228_vm0, %v239_v27, 0.0  ;;  %v583_v32 = vsel %vm228_vm0, %v519_v30, 0.0  ;;  %v582_v33 = vsel %vm228_vm0, %v518_v31, 0.0  ;;  %1215 = vmatpush3.bf16.msra.mxu1 %v1351_v40  ;;  %v1890_v50 = vld [vmem:[%s1760_s6 + $0x70] sm:$0xff]  ;;  %v1893_v51 = vld [vmem:[%s1760_s6 + $0x60] sm:$0xff]  ;;  %p1490_p8 = pneg %p1489_p6 }
  0x64   : > { %524 = vadd.xlane.f32.xlu0 %v1789_v6  ;;  %v284_v38 = vsel %vm228_vm0, %v1862_v35, 0.0  ;;  %v283_v39 = vsel %vm228_vm0, %v1865_v36, 0.0  ;;  %1241 = vmatpush3.bf16.msra.mxu0 %v1350_v37  ;;  %v561_v46 = vsel %vm228_vm0, %v1876_v42, 0.0  ;;  %v560_v47 = vsel %vm228_vm0, %v1879_v43, 0.0  ;;  %v1357_v52 = vld [vmem:[#allocation5 + $0x58] sm:$0xff]   ;;  %v1358_v53 = vld [vmem:[#allocation5 + $0x28] sm:$0xff]  }
  0x65   : > { %289 = vadd.xlane.f32.xlu1 %v280_v7  ;;  %1242 = vmatprep.subr.bf16.mxu0 %v1352_v41  ;;  %v286_v54 = vsel %vm228_vm0, %v1890_v50, 0.0  ;;  %v285_v55 = vsel %vm228_vm0, %v1893_v51, 0.0  ;;  %v1359_v56 = vld [vmem:[#allocation5 + $0x60] sm:$0xff]   ;;  %v1904_v57 = vld [vmem:[%s1760_s6 + $0x78] sm:$0xff]  ;;  %v1907_v58 = vld [vmem:[%s1760_s6 + $0x68] sm:$0xff]  ;;  %v241_v5 = vmul.f32 %v1865_v36, %v1865_v36  ;;  %s1493_s25 = scalar_lea.vmem %s1492_s19, 2048 }
  0x66   : > { %1216 = vmatprep.subr.bf16.mxu1 %v1353_v44  ;;  %v1360_v59 = vld [vmem:[#allocation5 + $0x30] sm:$0xff]   ;;  %v1361_v60 = vld [vmem:[#allocation5 + $0x68] sm:$0xff]   ;;  %v1362_v61 = vld [vmem:[#allocation5 + $0x38] sm:$0xff]   ;;  %v563_v62 = vsel %vm228_vm0, %v1904_v57, 0.0  ;;  %v562_v63 = vsel %vm228_vm0, %v1907_v58, 0.0  ;;  %p1495_p11 = scmp.lt.s32.totalorder %s1493_s25, %s1487_s8 }
  0x67   : > { %1217 = vmatpush3.bf16.msra.mxu1 %v1353_v44  ;;  %v1363_v7 = vld [vmem:[#allocation5 + $0x70] sm:$0xff]  }
  0x68   : > { %564 = vadd.xlane.f32.xlu0 %v556_v8  ;;  %1243 = vmatpush3.bf16.msra.mxu0 %v1352_v41  ;;  %v1364_v8 = vld [vmem:[#allocation5 + $0x78] sm:$0xff]   ;;  %p1496_p0 = por %p1495_p11, %p1494_p12 }
  0x69   : > { %566 = vadd.xlane.f32.xlu1 %v557_v9  ;;  %1244 = vmatprep.subr.bf16.mxu0 %v1354_v45  ;;  %v308_v9 = vsel %vm228_vm0, %v242_v0, 0.0 }
  0x6a   : > { %1218 = vmatprep.subr.bf16.mxu1 %v1355_v48  ;;  %p1497_p5 = pnand %p1496_p0, %p1490_p8 }
  0x6b   : > { %1219 = vmatpush3.bf16.msra.mxu1 %v1355_v48 }
  0x6c   : > { %249 = vadd.xlane.f32.xlu0 %v1802_v10  ;;  %1245 = vmatpush3.bf16.msra.mxu0 %v1354_v45 }
  0x6d   : > { %251 = vadd.xlane.f32.xlu1 %v1805_v11  ;;  %1246 = vmatprep.subr.bf16.mxu0 %v1356_v49 }
  0x6e   : > { %1220 = vmatprep.subr.bf16.mxu1 %v1357_v52 }
  0x6f   : > { %1221 = vmatpush3.bf16.msra.mxu1 %v1357_v52 }
  0x70   : > { %291 = vadd.xlane.f32.xlu0 %v281_v12  ;;  %1247 = vmatpush3.bf16.msra.mxu0 %v1356_v49  ;;  %v307_v12 = vsel %vm228_vm0, %v241_v5, 0.0 }
  0x71   : > { %293 = vadd.xlane.f32.xlu1 %v282_v13  ;;  %1248 = vmatprep.subr.bf16.mxu0 %v1358_v53  ;;  %v521_v13 = vmul.f32 %v1876_v42, %v1876_v42 }
  0x72   : > { %1222 = vmatprep.subr.bf16.mxu1 %v1359_v56 }
  0x73   : > { %1223 = vmatpush3.bf16.msra.mxu1 %v1359_v56 }
  0x74   : > { %528 = vadd.xlane.f32.xlu0 %v1816_v14  ;;  %1249 = vmatpush3.bf16.msra.mxu0 %v1358_v53 }
  0x75   : > { %530 = vadd.xlane.f32.xlu1 %v1819_v15  ;;  %1250 = vmatprep.subr.bf16.mxu0 %v1360_v59 }
  0x76   : > { %1224 = vmatprep.subr.bf16.mxu1 %v1361_v60 }
  0x77   : > { %1225 = vmatpush3.bf16.msra.mxu1 %v1361_v60 }
  0x78   : > { %568 = vadd.xlane.f32.xlu0 %v558_v16  ;;  %1251 = vmatpush3.bf16.msra.mxu0 %v1360_v59  ;;  %v520_v16 = vmul.f32 %v1879_v43, %v1879_v43 }
  0x79   : > { %570 = vadd.xlane.f32.xlu1 %v559_v17  ;;  %1252 = vmatprep.subr.bf16.mxu0 %v1362_v61  ;;  %v585_v17 = vsel %vm228_vm0, %v521_v13, 0.0 }
  0x7a   : > { %1226 = vmatprep.subr.bf16.mxu1 %v1363_v7 }
  0x7b   : > { %1227 = vmatpush3.bf16.msra.mxu1 %v1363_v7 }
  0x7c   : > { %261 = vadd.xlane.f32.xlu0 %v237_v19  ;;  %1253 = vmatpush3.bf16.msra.mxu0 %v1362_v61  ;;  %v244_v19 = vmul.f32 %v1890_v50, %v1890_v50 }
  0x7d   : > { %263 = vadd.xlane.f32.xlu1 %v238_v18  ;;  %1228 = vmatprep.subr.bf16.mxu1 %v1364_v8  ;;  %v584_v18 = vsel %vm228_vm0, %v520_v16, 0.0 }
  0x7f   : > { %1229 = vmatpush3.bf16.msra.mxu1 %v1364_v8 }
  0x80   : > { %311 = vadd.xlane.f32.xlu0 %v303_v21  ;;  %v310_v21 = vsel %vm228_vm0, %v244_v19, 0.0 }
  0x81   : > { %313 = vadd.xlane.f32.xlu1 %v304_v20  ;;  %v243_v20 = vmul.f32 %v1893_v51, %v1893_v51 }
  0x84   : > { %540 = vadd.xlane.f32.xlu0 %v516_v23  ;;  %v523_v23 = vmul.f32 %v1904_v57, %v1904_v57 }
  0x85   : > { %542 = vadd.xlane.f32.xlu1 %v517_v22  ;;  %v309_v22 = vsel %vm228_vm0, %v243_v20, 0.0 }
  0x88   : > { %588 = vadd.xlane.f32.xlu0 %v580_v25  ;;  %v587_v25 = vsel %vm228_vm0, %v523_v23, 0.0 }
  0x89   : > { %590 = vadd.xlane.f32.xlu1 %v581_v24  ;;  %v522_v24 = vmul.f32 %v1907_v58, %v1907_v58 }
  0x8c   : > { %265 = vadd.xlane.f32.xlu0 %v239_v27 }
  0x8d   : > { %267 = vadd.xlane.f32.xlu1 %v240_v26  ;;  %v586_v26 = vsel %vm228_vm0, %v522_v24, 0.0 }
  0x90   : > { %315 = vadd.xlane.f32.xlu0 %v305_v29 }
  0x91   : > { %317 = vadd.xlane.f32.xlu1 %v306_v28 }
  0x94   : > { %544 = vadd.xlane.f32.xlu0 %v518_v31 }
  0x95   : > { %546 = vadd.xlane.f32.xlu1 %v519_v30 }
  0x98   : > { %592 = vadd.xlane.f32.xlu0 %v582_v33 }
  0x99   : > { %594 = vadd.xlane.f32.xlu1 %v583_v32 }
  0x9c   : > { %253 = vadd.xlane.f32.xlu0 %v1865_v36 }
  0x9d   : > { %255 = vadd.xlane.f32.xlu1 %v1862_v35 }
  0xa0   : > { %295 = vadd.xlane.f32.xlu0 %v283_v39 }
  0xa1   : > { %297 = vadd.xlane.f32.xlu1 %v284_v38 }
  0xa4   : > { %532 = vadd.xlane.f32.xlu0 %v1879_v43 }
  0xa5   : > { %534 = vadd.xlane.f32.xlu1 %v1876_v42 }
  0xa8   : > { %572 = vadd.xlane.f32.xlu0 %v560_v47 }
  0xa9   : > { %574 = vadd.xlane.f32.xlu1 %v561_v46 }
  0xac   : > { %257 = vadd.xlane.f32.xlu0 %v1893_v51 }
  0xad   : > { %259 = vadd.xlane.f32.xlu1 %v1890_v50 }
  0xb0   : > { %299 = vadd.xlane.f32.xlu0 %v285_v55 }
  0xb1   : > { %301 = vadd.xlane.f32.xlu1 %v286_v54 }
  0xb4   : > { %536 = vadd.xlane.f32.xlu0 %v1907_v58 }
  0xb5   : > { %538 = vadd.xlane.f32.xlu1 %v1904_v57 }
  0xb8   : > { %576 = vadd.xlane.f32.xlu0 %v562_v63 }
  0xb9   : > { %578 = vadd.xlane.f32.xlu1 %v563_v62 }
  0xbc   : > { %269 = vadd.xlane.f32.xlu0 %v241_v5 }
  0xbd   : > { %271 = vadd.xlane.f32.xlu1 %v242_v0 }
  0xc0   : > { %319 = vadd.xlane.f32.xlu0 %v307_v12 }
  0xc1   : > { %321 = vadd.xlane.f32.xlu1 %v308_v9 }
  0xc4   : > { %548 = vadd.xlane.f32.xlu0 %v520_v16 }
  0xc5   : > { %550 = vadd.xlane.f32.xlu1 %v521_v13 }
  0xc8   : > { %596 = vadd.xlane.f32.xlu0 %v584_v18 }
  0xc9   : > { %598 = vadd.xlane.f32.xlu1 %v585_v17 }
  0xcc   : > { %273 = vadd.xlane.f32.xlu0 %v243_v20 }
  0xcd   : > { %275 = vadd.xlane.f32.xlu1 %v244_v19 }
  0xd0   : > { %323 = vadd.xlane.f32.xlu0 %v309_v22 }
  0xd1   : > { %325 = vadd.xlane.f32.xlu1 %v310_v21 }
  0xd4   : > { %552 = vadd.xlane.f32.xlu0 %v522_v24 }
  0xd5   : > { %554 = vadd.xlane.f32.xlu1 %v523_v23 }
  0xd8   : > { %600 = vadd.xlane.f32.xlu0 %v586_v26 }
  0xd9   : > { %602 = vadd.xlane.f32.xlu1 %v587_v25 }
  0xe9   : > { %v527_v27 = vpop.xlane.xlu1 %526  ;;  %v246_v28 = vpop.xlane.xlu0 %245 }
  0xed   : > { %v248_v29 = vpop.xlane.xlu0 %247 }
  0xee   : > { %v288_v30 = vpop.xlane.xlu1 %287 }
  0xef   : > { %v335_v45 = vsub.f32 %v246_v28, %v288_v30  ;;  %v327_v49 = vmul.f32 0.015625, %v288_v30 }
  0xf1   : > { %v525_v31 = vpop.xlane.xlu0 %524  ;;  %v343_v52 = vmul.f32 0.015625, %v335_v45  ;;  %v359_v59 = vmul.f32 %v327_v49, %v327_v49 }
  0xf2   : > { %v290_v32 = vpop.xlane.xlu1 %289 }
  0xf3   : > { %v336_v48 = vsub.f32 %v248_v29, %v290_v32  ;;  %v328_v53 = vmul.f32 0.015625, %v290_v32  ;;  %v399_v60 = vmul.f32 %v343_v52, %v343_v52  ;;  %v1965_v7 = vsel %vm228_vm0, %v327_v49, %v343_v52 }
  0xf4   : > { %v471_v30 = vsub.f32 %v1777_v3, %v1965_v7 }
  0xf5   : > { %v565_v33 = vpop.xlane.xlu0 %564  ;;  %v344_v56 = vmul.f32 0.015625, %v336_v48  ;;  %v360_v61 = vmul.f32 %v328_v53, %v328_v53 }
  0xf6   : > { %v567_v34 = vpop.xlane.xlu1 %566  ;;  %v1961_v62 = vmul.f32 0.015625, %v565_v33  ;;  %v612_v63 = vsub.f32 %v525_v31, %v565_v33 }
  0xf7   : > { %v400_v16 = vmul.f32 %v344_v56, %v344_v56  ;;  %v605_v17 = vmul.f32 0.015625, %v567_v34  ;;  %v613_v18 = vsub.f32 %v527_v27, %v567_v34  ;;  %v1969_v19 = vsel %vm228_vm0, %v328_v53, %v344_v56 }
  0xf8   : > { %v1971_v24 = vmul.f32 0.015625, %v612_v63  ;;  %v636_v25 = vmul.f32 %v1961_v62, %v1961_v62  ;;  %v472_v49 = vsub.f32 %v1782_v4, %v1969_v19 }
  0xf9   : > { %v250_v37 = vpop.xlane.xlu0 %249  ;;  %v621_v34 = vmul.f32 0.015625, %v613_v18  ;;  %v637_v45 = vmul.f32 %v605_v17, %v605_v17 }
  0xfa   : > { %v1949_v38 = vpop.xlane.xlu1 %251 }
  0xfd   : > { %v292_v39 = vpop.xlane.xlu0 %291 }
  0xfe   : > { %v1951_v40 = vpop.xlane.xlu1 %293  ;;  %v337_v26 = vsub.f32 %v250_v37, %v292_v39  ;;  %v1983_v56 = vmul.f32 0.015625, %v292_v39 }
  0xff   : > { %v338_v48 = vsub.f32 %v1949_v38, %v1951_v40 }
 0x101   : > { %v1953_v41 = vpop.xlane.xlu0 %528 }
 0x102   : > { %v1955_v44 = vpop.xlane.xlu1 %530 }
 0x105   : > { %v1957_v46 = vpop.xlane.xlu0 %568 }
 0x106   : > { %v1959_v47 = vpop.xlane.xlu1 %570 }
 0x109   : > { %v262_v55 = vpop.xlane.xlu0 %261 }
 0x10a   : > { %v264_v54 = vpop.xlane.xlu1 %263 }
 0x10d   : > { %v312_v5 = vpop.xlane.xlu0 %311 }
 0x10e   : > { %v314_v0 = vpop.xlane.xlu1 %313  ;;  %v351_v12 = vmul.f32 0.015625, %v312_v5  ;;  %v383_v13 = vsub.f32 %v262_v55, %v312_v5  ;;  %v676_v55 = vmul.f32 %v1971_v24, %v1971_v24 }
 0x10f   : > { %v352_v8 = vmul.f32 0.015625, %v314_v0  ;;  %v384_v9 = vsub.f32 %v264_v54, %v314_v0 }
 0x110   : > { %v367_v22 = vsub.f32 %v351_v12, %v359_v59  ;;  %v391_v23 = vmul.f32 0.015625, %v383_v13  ;;  %v1985_v59 = vmul.f32 0.015625, %v337_v26  ;;  %v677_v13 = vmul.f32 %v621_v34, %v621_v34 }
 0x111   : > { %v368_v20 = vsub.f32 %v352_v8, %v360_v61  ;;  %v392_v21 = vmul.f32 0.015625, %v384_v9  ;;  %v541_v29 = vpop.xlane.xlu0 %540 }
 0x112   : > { %v543_v28 = vpop.xlane.xlu1 %542  ;;  %v375_v32 = vmax.f32 %v367_v22, 0.0  ;;  %v407_v33 = vsub.f32 %v391_v23, %v399_v60  ;;  %v1988_v60 = vmul.f32 0.015625, %v1951_v40  ;;  %v361_v23 = vmul.f32 %v1983_v56, %v1983_v56 }
 0x113   : > { %v376_v27 = vmax.f32 %v368_v20, 0.0  ;;  %v408_v31 = vsub.f32 %v392_v21, %v400_v16  ;;  %v1990_v16 = vmul.f32 0.015625, %v338_v48  ;;  %v614_v48 = vsub.f32 %v1953_v41, %v1957_v46 }
 0x114   : > { %v415_v37 = vmax.f32 %v407_v33, 0.0  ;;  %v423_v54 = vadd.f32 1e-05, %v375_v32  ;;  %v362_v26 = vmul.f32 %v1988_v60, %v1988_v60 }
 0x115   : > { %v416_v52 = vmax.f32 %v408_v31, 0.0  ;;  %v424_v53 = vadd.f32 1e-05, %v376_v27  ;;  %v589_v63 = vpop.xlane.xlu0 %588  ;;  %v401_v27 = vmul.f32 %v1985_v59, %v1985_v59  ;;  %v402_v33 = vmul.f32 %v1990_v16, %v1990_v16 }
 0x116   : > { %v591_v61 = vpop.xlane.xlu1 %590  ;;  %v439_v0 = vadd.f32 1e-05, %v415_v37  ;;  %v628_v9 = vmul.f32 0.015625, %v589_v63  ;;  %v660_v12 = vsub.f32 %v541_v29, %v589_v63  ;;  %v1998_v29 = vsel %vm228_vm0, %v605_v17, %v621_v34 }
 0x117   : > { %1365 = vrsqrt.f32 %v424_v53  ;;  %v440_v38 = vadd.f32 1e-05, %v416_v52  ;;  %v629_v5 = vmul.f32 0.015625, %v591_v61  ;;  %v661_v8 = vsub.f32 %v543_v28, %v591_v61 }
 0x118   : > { %1367 = vrsqrt.f32 %v423_v54  ;;  %v644_v20 = vsub.f32 %v628_v9, %v636_v25  ;;  %v668_v40 = vmul.f32 0.015625, %v660_v12  ;;  %v615_v17 = vsub.f32 %v1955_v44, %v1959_v47 }
 0x119   : > { %1369 = vrsqrt.f32 %v440_v38  ;;  %v645_v39 = vsub.f32 %v629_v5, %v637_v45  ;;  %v669_v18 = vmul.f32 0.015625, %v661_v8  ;;  %v266_v22 = vpop.xlane.xlu0 %265  ;;  %v2005_v45 = vmul.f32 0.015625, %v1957_v46 }
 0x11a   : > { %1371 = vrsqrt.f32 %v439_v0  ;;  %v268_v21 = vpop.xlane.xlu1 %267  ;;  %v652_v32 = vmax.f32 %v644_v20, 0.0  ;;  %v684_v25 = vsub.f32 %v668_v40, %v676_v55  ;;  %v2012_v55 = vmul.f32 0.015625, %v1959_v47 }
 0x11b   : > { %v653_v28 = vmax.f32 %v645_v39, 0.0  ;;  %v685_v31 = vsub.f32 %v669_v18, %v677_v13  ;;  %v2014_v39 = vmul.f32 0.015625, %v614_v48  ;;  %v2016_v18 = vmul.f32 0.015625, %v615_v17 }
 0x11c   : > { %v692_v53 = vmax.f32 %v684_v25, 0.0  ;;  %v700_v37 = vadd.f32 1e-05, %v652_v32 }
 0x11d   : > { %v701_v52 = vadd.f32 1e-05, %v653_v28  ;;  %v693_v34 = vmax.f32 %v685_v31, 0.0  ;;  %v316_v61 = vpop.xlane.xlu0 %315  ;;  %v678_v3 = vmul.f32 %v2014_v39, %v2014_v39 }
 0x11e   : > { %v318_v54 = vpop.xlane.xlu1 %317  ;;  %v353_v0 = vmul.f32 0.015625, %v316_v61  ;;  %v716_v8 = vadd.f32 1e-05, %v692_v53  ;;  %v385_v9 = vsub.f32 %v266_v22, %v316_v61 }
 0x11f   : > { %v354_v63 = vmul.f32 0.015625, %v318_v54  ;;  %v386_v38 = vsub.f32 %v268_v21, %v318_v54  ;;  %1373 = vrsqrt.f32 %v701_v52  ;;  %v717_v5 = vadd.f32 1e-05, %v693_v34 }
 0x120   : > { %1375 = vrsqrt.f32 %v700_v37  ;;  %v369_v44 = vsub.f32 %v353_v0, %v361_v23  ;;  %v393_v47 = vmul.f32 0.015625, %v385_v9  ;;  %v639_v23 = vmul.f32 %v2012_v55, %v2012_v55 }
 0x121   : > { %v1366_v41 = vpop.eup %1365  ;;  %v370_v46 = vsub.f32 %v354_v63, %v362_v26  ;;  %v394_v12 = vmul.f32 0.015625, %v386_v38  ;;  %1377 = vrsqrt.f32 %v717_v5  ;;  %v545_v40 = vpop.xlane.xlu0 %544  ;;  %v638_v26 = vmul.f32 %v2005_v45, %v2005_v45 }
 0x122   : > { %v1368_v13 = vpop.eup %1367  ;;  %v547_v20 = vpop.xlane.xlu1 %546  ;;  %1379 = vrsqrt.f32 %v716_v8  ;;  %v377_v32 = vmax.f32 %v369_v44, 0.0  ;;  %v409_v25 = vsub.f32 %v393_v47, %v401_v27 }
 0x123   : > { %v1370_v21 = vpop.eup %1369  ;;  %v378_v28 = vmax.f32 %v370_v46, 0.0  ;;  %v410_v31 = vsub.f32 %v394_v12, %v402_v33  ;;  %v679_v33 = vmul.f32 %v2016_v18, %v2016_v18 }
 0x124   : > { %v1372_v22 = vpop.eup %1371  ;;  %v464_v48 = vsel %vm228_vm0, %v1366_v41, %v1370_v21  ;;  %v425_v34 = vadd.f32 1e-05, %v377_v32  ;;  %v417_v37 = vmax.f32 %v409_v25, 0.0  ;;  %v749_v25 = vsub.f32 %v1774_v2, %v1998_v29 }
 0x125   : > { %v418_v52 = vmax.f32 %v410_v31, 0.0  ;;  %v426_v17 = vadd.f32 1e-05, %v378_v28  ;;  %v463_v53 = vsel %vm228_vm0, %v1368_v13, %v1372_v22  ;;  %v593_v61 = vpop.xlane.xlu0 %592  ;;  %v480_v27 = vmul.f32 %v472_v49, %v464_v48 }
 0x126   : > { %v595_v54 = vpop.xlane.xlu1 %594  ;;  %v479_v63 = vmul.f32 %v471_v30, %v463_v53  ;;  %v441_v8 = vadd.f32 1e-05, %v417_v37  ;;  %v630_v9 = vmul.f32 0.015625, %v593_v61  ;;  %v662_v41 = vsub.f32 %v545_v40, %v593_v61 }
 0x127   : > { %1381 = vrsqrt.f32 %v426_v17  ;;  %v442_v38 = vadd.f32 1e-05, %v418_v52  ;;  %v631_v0 = vmul.f32 0.015625, %v595_v54  ;;  %v663_v5 = vsub.f32 %v547_v20, %v595_v54 }
 0x128   : > { %1383 = vrsqrt.f32 %v425_v34  ;;  %v487_v44 = vpack.c.bf16 %v480_v27, %v479_v63  ;;  %v646_v7 = vsub.f32 %v630_v9, %v638_v26  ;;  %v670_v4 = vmul.f32 0.015625, %v662_v41 }
 0x129   : > { %1385 = vrsqrt.f32 %v442_v38  ;;  %v647_v46 = vsub.f32 %v631_v0, %v639_v23  ;;  %v671_v12 = vmul.f32 0.015625, %v663_v5  ;;  %v1374_v13 = vpop.eup %1373  ;;  %v2038_v30 = vpop.xlane.xlu0 %253  ;;  %v732_v31 = vsel %vm228_vm0, %v1961_v62, %v1971_v24 }
 0x12a   : > { %1387 = vrsqrt.f32 %v441_v8  ;;  %v2036_v19 = vpop.xlane.xlu1 %255  ;;  %v1376_v49 = vpop.eup %1375  ;;  %1254 = vmatprep.mubr.bf16.mxu0 %v487_v44  ;;  %v654_v21 = vmax.f32 %v646_v7, 0.0  ;;  %v686_v28 = vsub.f32 %v670_v4, %v678_v3  ;;  %v748_v62 = vsub.f32 %v1789_v6, %v732_v31 }
 0x12b   : > { %v655_v47 = vmax.f32 %v647_v46, 0.0  ;;  %v687_v20 = vsub.f32 %v671_v12, %v679_v33  ;;  %v1378_v40 = vpop.eup %1377  ;;  %v458_v37 = vsel %vm228_vm0, %v1988_v60, %v1990_v16  ;;  %v457_v29 = vsel %vm228_vm0, %v1983_v56, %v1985_v59 }
 0x12c   : > { %v1380_v32 = vpop.eup %1379  ;;  %v741_v23 = vsel %vm228_vm0, %v1374_v13, %v1378_v40  ;;  %v694_v48 = vmax.f32 %v686_v28, 0.0  ;;  %v702_v52 = vadd.f32 1e-05, %v654_v21  ;;  %v474_v0 = vsub.f32 %v1805_v11, %v458_v37 }
 0x12d   : > { %v695_v22 = vmax.f32 %v687_v20, 0.0  ;;  %v703_v26 = vadd.f32 1e-05, %v655_v47  ;;  %v296_v34 = vpop.xlane.xlu0 %295  ;;  %v740_v53 = vsel %vm228_vm0, %v1376_v49, %v1380_v32  ;;  %v757_v24 = vmul.f32 %v749_v25, %v741_v23 }
 0x12e   : > { %v298_v17 = vpop.xlane.xlu1 %297  ;;  %v718_v54 = vadd.f32 1e-05, %v694_v48  ;;  %v756_v61 = vmul.f32 %v748_v62, %v740_v53  ;;  %v473_v16 = vsub.f32 %v1802_v10, %v457_v29  ;;  %v735_v11 = vsel %vm228_vm0, %v2012_v55, %v2016_v18 }
 0x12f   : > { %1389 = vrsqrt.f32 %v703_v26  ;;  %v719_v33 = vadd.f32 1e-05, %v695_v22  ;;  %v734_v10 = vsel %vm228_vm0, %v2005_v45, %v2014_v39  ;;  %v751_v49 = vsub.f32 %v1819_v15, %v735_v11 }
 0x130   : > { %1391 = vrsqrt.f32 %v702_v52  ;;  %v764_v5 = vpack.c.bf16 %v757_v24, %v756_v61  ;;  %v750_v20 = vsub.f32 %v1816_v14, %v734_v10  ;;  %v340_v15 = vsub.f32 %v2036_v19, %v298_v17 }
 0x131   : > { %v1382_v2 = vpop.eup %1381  ;;  %1393 = vrsqrt.f32 %v719_v33  ;;  %v2059_v6 = vpop.xlane.xlu0 %532  ;;  %v339_v14 = vsub.f32 %v2038_v30, %v296_v34  ;;  %v332_v23 = vmul.f32 0.015625, %v298_v17  ;;  %v331_v25 = vmul.f32 0.015625, %v296_v34 }
 0x132   : > { %v1384_v63 = vpop.eup %1383  ;;  %1395 = vrsqrt.f32 %v718_v54  ;;  %v535_v27 = vpop.xlane.xlu1 %534  ;;  %1230 = vmatprep.mubr.bf16.mxu1 %v764_v5  ;;  %v348_v48 = vmul.f32 0.015625, %v340_v15 }
 0x133   : > { %v1386_v38 = vpop.eup %1385  ;;  %v347_v52 = vmul.f32 0.015625, %v339_v14  ;;  %v364_v24 = vmul.f32 %v332_v23, %v332_v23  ;;  %v363_v37 = vmul.f32 %v331_v25, %v331_v25 }
 0x134   : > { %v1388_v60 = vpop.eup %1387  ;;  %v466_v8 = vsel %vm228_vm0, %v1382_v2, %v1386_v38  ;;  %v404_v54 = vmul.f32 %v348_v48, %v348_v48  ;;  %v2101_v2 = vsel %vm228_vm0, %v332_v23, %v348_v48 }
 0x135   : > { %v465_v56 = vsel %vm228_vm0, %v1384_v63, %v1388_v60  ;;  %v482_v59 = vmul.f32 %v474_v0, %v466_v8  ;;  %v2067_v41 = vpop.xlane.xlu0 %572  ;;  %v2105_v19 = vsel %vm228_vm0, %v331_v25, %v347_v52  ;;  %v403_v0 = vmul.f32 %v347_v52, %v347_v52 }
 0x136   : > { %v575_v9 = vpop.xlane.xlu1 %574  ;;  %v481_v46 = vmul.f32 %v473_v16, %v465_v56  ;;  %v608_v5 = vmul.f32 0.015625, %v2067_v41  ;;  %v616_v60 = vsub.f32 %v2059_v6, %v2067_v41 }
 0x137   : > { %v617_v62 = vsub.f32 %v535_v27, %v575_v9  ;;  %v609_v30 = vmul.f32 0.015625, %v575_v9  ;;  %v476_v9 = vsub.f32 %v1862_v35, %v2101_v2 }
 0x138   : > { %v488_v12 = vpack.c.bf16 %v482_v59, %v481_v46  ;;  %v475_v46 = vsub.f32 %v1865_v36, %v2105_v19  ;;  %v624_v41 = vmul.f32 0.015625, %v616_v60 }
 0x139   : > { %v1390_v44 = vpop.eup %1389  ;;  %v2079_v7 = vpop.xlane.xlu0 %257  ;;  %v625_v27 = vmul.f32 0.015625, %v617_v62  ;;  %v641_v11 = vmul.f32 %v609_v30, %v609_v30 }
 0x13a   : > { %v1392_v13 = vpop.eup %1391  ;;  %1255 = vmatmul.mubr.bf16.vlgmr.msra.gmra.mrb[0].mxu0 %v488_v12  ;;  %v2077_v3 = vpop.xlane.xlu1 %259 }
 0x13b   : > { %v1394_v4 = vpop.eup %1393  ;;  %v681_v6 = vmul.f32 %v625_v27, %v625_v27  ;;  %v2119_v15 = vsel %vm228_vm0, %v609_v30, %v625_v27 }
 0x13c   : > { %v1396_v47 = vpop.eup %1395  ;;  %v743_v55 = vsel %vm228_vm0, %v1390_v44, %v1394_v4 }
 0x13d   : > { %v742_v18 = vsel %vm228_vm0, %v1392_v13, %v1396_v47  ;;  %v759_v40 = vmul.f32 %v751_v49, %v743_v55  ;;  %v2087_v39 = vpop.xlane.xlu0 %299 }
 0x13e   : > { %v302_v45 = vpop.xlane.xlu1 %301  ;;  %v758_v21 = vmul.f32 %v750_v20, %v742_v18  ;;  %v640_v20 = vmul.f32 %v608_v5, %v608_v5  ;;  %v341_v55 = vsub.f32 %v2079_v7, %v2087_v39  ;;  %v2126_v23 = vmul.f32 0.015625, %v2087_v39 }
 0x13f   : > { %v342_v12 = vsub.f32 %v2077_v3, %v302_v45  ;;  %v2121_v3 = vmul.f32 0.015625, %v302_v45 }
 0x140   : > { %v765_v28 = vpack.c.bf16 %v759_v40, %v758_v21 }
 0x141   : > { %v2091_v32 = vpop.xlane.xlu0 %536  ;;  %v2123_v14 = vmul.f32 0.015625, %v342_v12 }
 0x142   : > { %1231 = vmatmul.mubr.bf16.vlgmr.msra.gmra.mrb[0].mxu1 %v765_v28  ;;  %v2089_v31 = vpop.xlane.xlu1 %538 }
 0x143   : > { %v406_v27 = vmul.f32 %v2123_v14, %v2123_v14 }
 0x145   : > { %v2097_v26 = vpop.xlane.xlu0 %576 }
 0x146   : > { %v2095_v22 = vpop.xlane.xlu1 %578  ;;  %v2148_v12 = vmul.f32 0.015625, %v2097_v26 }
 0x149   : > { %v270_v33 = vpop.xlane.xlu0 %269 }
 0x14a   : > { %v272_v53 = vpop.xlane.xlu1 %271 }
 0x14d   : > { %v320_v17 = vpop.xlane.xlu0 %319 }
 0x14e   : > { %v322_v29 = vpop.xlane.xlu1 %321  ;;  %v355_v63 = vmul.f32 0.015625, %v320_v17  ;;  %v387_v38 = vsub.f32 %v270_v33, %v320_v17 }
 0x14f   : > { %v356_v34 = vmul.f32 0.015625, %v322_v29  ;;  %v388_v61 = vsub.f32 %v272_v53, %v322_v29 }
 0x150   : > { %v371_v56 = vsub.f32 %v355_v63, %v363_v37  ;;  %v395_v59 = vmul.f32 0.015625, %v387_v38  ;;  %v680_v37 = vmul.f32 %v624_v41, %v624_v41  ;;  %v366_v63 = vmul.f32 %v2121_v3, %v2121_v3 }
 0x151   : > { %v372_v16 = vsub.f32 %v356_v34, %v364_v24  ;;  %v396_v8 = vmul.f32 0.015625, %v388_v61  ;;  %v549_v10 = vpop.xlane.xlu0 %548  ;;  %v2132_v61 = vsel %vm228_vm0, %v608_v5, %v624_v41  ;;  %v365_v38 = vmul.f32 %v2126_v23, %v2126_v23 }
 0x152   : > { %v551_v44 = vpop.xlane.xlu1 %550  ;;  %v379_v49 = vmax.f32 %v371_v56, 0.0  ;;  %v411_v47 = vsub.f32 %v395_v59, %v403_v0  ;;  %v2143_v59 = vmul.f32 0.015625, %v2095_v22  ;;  %v619_v5 = vsub.f32 %v2089_v31, %v2095_v22 }
 0x153   : > { %v380_v13 = vmax.f32 %v372_v16, 0.0  ;;  %v412_v4 = vsub.f32 %v396_v8, %v404_v54  ;;  %v2128_v54 = vmul.f32 0.015625, %v341_v55 }
 0x154   : > { %v419_v21 = vmax.f32 %v411_v47, 0.0  ;;  %v427_v28 = vadd.f32 1e-05, %v379_v49  ;;  %v618_v47 = vsub.f32 %v2091_v32, %v2097_v26 }
 0x155   : > { %v420_v18 = vmax.f32 %v412_v4, 0.0  ;;  %v428_v40 = vadd.f32 1e-05, %v380_v13  ;;  %v597_v48 = vpop.xlane.xlu0 %596  ;;  %v405_v56 = vmul.f32 %v2128_v54, %v2128_v54 }
 0x156   : > { %v599_v25 = vpop.xlane.xlu1 %598  ;;  %v443_v7 = vadd.f32 1e-05, %v419_v21  ;;  %v632_v62 = vmul.f32 0.015625, %v597_v48  ;;  %v664_v24 = vsub.f32 %v549_v10, %v597_v48  ;;  %v2152_v48 = vmul.f32 0.015625, %v619_v5 }
 0x157   : > { %1397 = vrsqrt.f32 %v428_v40  ;;  %v444_v52 = vadd.f32 1e-05, %v420_v18  ;;  %v633_v53 = vmul.f32 0.015625, %v599_v25  ;;  %v665_v33 = vsub.f32 %v551_v44, %v599_v25 }
 0x158   : > { %1399 = vrsqrt.f32 %v427_v28  ;;  %v648_v29 = vsub.f32 %v632_v62, %v640_v20  ;;  %v672_v39 = vmul.f32 0.015625, %v664_v24 }
 0x159   : > { %1401 = vrsqrt.f32 %v444_v52  ;;  %v649_v45 = vsub.f32 %v633_v53, %v641_v11  ;;  %v673_v30 = vmul.f32 0.015625, %v665_v33  ;;  %v274_v34 = vpop.xlane.xlu0 %273  ;;  %v643_v52 = vmul.f32 %v2143_v59, %v2143_v59 }
 0x15a   : > { %1403 = vrsqrt.f32 %v443_v7  ;;  %v276_v17 = vpop.xlane.xlu1 %275  ;;  %v656_v16 = vmax.f32 %v648_v29, 0.0  ;;  %v688_v8 = vsub.f32 %v672_v39, %v680_v37 }
 0x15b   : > { %v657_v0 = vmax.f32 %v649_v45, 0.0  ;;  %v689_v60 = vsub.f32 %v673_v30, %v681_v6  ;;  %v2156_v45 = vmul.f32 0.015625, %v618_v47  ;;  %v642_v30 = vmul.f32 %v2148_v12, %v2148_v12 }
 0x15c   : > { %v696_v10 = vmax.f32 %v688_v8, 0.0  ;;  %v704_v13 = vadd.f32 1e-05, %v656_v16 }
 0x15d   : > { %v705_v11 = vadd.f32 1e-05, %v657_v0  ;;  %v697_v44 = vmax.f32 %v689_v60, 0.0  ;;  %v324_v49 = vpop.xlane.xlu0 %323  ;;  %v683_v0 = vmul.f32 %v2152_v48, %v2152_v48  ;;  %v682_v36 = vmul.f32 %v2156_v45, %v2156_v45 }
 0x15e   : > { %v326_v4 = vpop.xlane.xlu1 %325  ;;  %v357_v20 = vmul.f32 0.015625, %v324_v49  ;;  %v720_v18 = vadd.f32 1e-05, %v696_v10  ;;  %v389_v40 = vsub.f32 %v274_v34, %v324_v49 }
 0x15f   : > { %v358_v6 = vmul.f32 0.015625, %v326_v4  ;;  %v390_v41 = vsub.f32 %v276_v17, %v326_v4  ;;  %1405 = vrsqrt.f32 %v705_v11  ;;  %v721_v55 = vadd.f32 1e-05, %v697_v44 }
 0x160   : > { %1407 = vrsqrt.f32 %v704_v13  ;;  %v373_v28 = vsub.f32 %v357_v20, %v365_v38  ;;  %v397_v32 = vmul.f32 0.015625, %v389_v40 }
 0x161   : > { %v1398_v31 = vpop.eup %1397  ;;  %v374_v22 = vsub.f32 %v358_v6, %v366_v63  ;;  %v398_v21 = vmul.f32 0.015625, %v390_v41  ;;  %1409 = vrsqrt.f32 %v721_v55  ;;  %v553_v7 = vpop.xlane.xlu0 %552  ;;  %v753_v55 = vsub.f32 %v1876_v42, %v2119_v15 }
 0x162   : > { %v1400_v25 = vpop.eup %1399  ;;  %v555_v26 = vpop.xlane.xlu1 %554  ;;  %1411 = vrsqrt.f32 %v720_v18  ;;  %v381_v24 = vmax.f32 %v373_v28, 0.0  ;;  %v413_v29 = vsub.f32 %v397_v32, %v405_v56  ;;  %v462_v15 = vsel %vm228_vm0, %v2121_v3, %v2123_v14 }
 0x163   : > { %v1402_v53 = vpop.eup %1401  ;;  %v382_v33 = vmax.f32 %v374_v22, 0.0  ;;  %v414_v62 = vsub.f32 %v398_v21, %v406_v27  ;;  %v752_v22 = vsub.f32 %v1879_v43, %v2132_v61 }
 0x164   : > { %v1404_v37 = vpop.eup %1403  ;;  %v468_v39 = vsel %vm228_vm0, %v1398_v31, %v1402_v53  ;;  %v429_v63 = vadd.f32 1e-05, %v381_v24  ;;  %v421_v27 = vmax.f32 %v413_v29, 0.0 }
 0x165   : > { %v422_v17 = vmax.f32 %v414_v62, 0.0  ;;  %v430_v34 = vadd.f32 1e-05, %v382_v33  ;;  %v467_v38 = vsel %vm228_vm0, %v1400_v25, %v1404_v37  ;;  %v601_v16 = vpop.xlane.xlu0 %600  ;;  %v484_v56 = vmul.f32 %v476_v9, %v468_v39 }
 0x166   : > { %v603_v60 = vpop.xlane.xlu1 %602  ;;  %v483_v8 = vmul.f32 %v475_v46, %v467_v38  ;;  %v445_v10 = vadd.f32 1e-05, %v421_v27  ;;  %v634_v13 = vmul.f32 0.015625, %v601_v16  ;;  %v666_v4 = vsub.f32 %v553_v7, %v601_v16 }
 0x167   : > { %1413 = vrsqrt.f32 %v430_v34  ;;  %v446_v5 = vadd.f32 1e-05, %v422_v17  ;;  %v635_v11 = vmul.f32 0.015625, %v603_v60  ;;  %v667_v44 = vsub.f32 %v555_v26, %v603_v60 }
 0x168   : > { %1415 = vrsqrt.f32 %v429_v63  ;;  %v489_v6 = vpack.c.bf16 %v484_v56, %v483_v8  ;;  %v650_v19 = vsub.f32 %v634_v13, %v642_v30  ;;  %v674_v35 = vmul.f32 0.015625, %v666_v4 }
 0x169   : > { %1417 = vrsqrt.f32 %v446_v5  ;;  %v651_v49 = vsub.f32 %v635_v11, %v643_v52  ;;  %v675_v47 = vmul.f32 0.015625, %v667_v44  ;;  %v1406_v41 = vpop.eup %1405  ;;  %v461_v33 = vsel %vm228_vm0, %v2126_v23, %v2128_v54 }
 0x16a   : > { %1419 = vrsqrt.f32 %v445_v10  ;;  %v1408_v2 = vpop.eup %1407  ;;  %1258 = vmatprep.mubr.bf16.mxu0 %v489_v6  ;;  %v658_v18 = vmax.f32 %v650_v19, 0.0  ;;  %v690_v40 = vsub.f32 %v674_v35, %v682_v36  ;;  %v478_v30 = vsub.f32 %v1890_v50, %v462_v15 }
 0x16b   : > { %v659_v9 = vmax.f32 %v651_v49, 0.0  ;;  %v691_v46 = vsub.f32 %v675_v47, %v683_v0  ;;  %v1410_v20 = vpop.eup %1409  ;;  %v477_v39 = vsub.f32 %v1893_v51, %v461_v33  ;;  %v739_v23 = vsel %vm228_vm0, %v2143_v59, %v2152_v48 }
 0x16c   : > { %v1412_v31 = vpop.eup %1411  ;;  %v745_v25 = vsel %vm228_vm0, %v1406_v41, %v1410_v20  ;;  %v698_v52 = vmax.f32 %v690_v40, 0.0  ;;  %v706_v32 = vadd.f32 1e-05, %v658_v18  ;;  %v738_v50 = vsel %vm228_vm0, %v2148_v12, %v2156_v45 }
 0x16d   : > { %v699_v21 = vmax.f32 %v691_v46, 0.0  ;;  %v707_v28 = vadd.f32 1e-05, %v659_v9  ;;  %v744_v26 = vsel %vm228_vm0, %v1408_v2, %v1412_v31  ;;  %v761_v7 = vmul.f32 %v753_v55, %v745_v25 }
 0x16e   : > { %v760_v42 = vmul.f32 %v752_v22, %v744_v26  ;;  %v722_v43 = vadd.f32 1e-05, %v698_v52  ;;  %v755_v0 = vsub.f32 %v1904_v57, %v739_v23  ;;  %v754_v60 = vsub.f32 %v1907_v58, %v738_v50  ;;  %v1182_v57 = vld [vmem:[%s2271_s2] ss:$0 sm:$0xff] }
 0x16f   : > { %1421 = vrsqrt.f32 %v707_v28  ;;  %v723_v53 = vadd.f32 1e-05, %v699_v21 }
 0x170   : > { %1423 = vrsqrt.f32 %v706_v32  ;;  %v766_v62 = vpack.c.bf16 %v761_v7, %v760_v42 }
 0x171   : > { %v1414_v61 = vpop.eup %1413  ;;  %1425 = vrsqrt.f32 %v723_v53 }
 0x172   : > { %v1416_v24 = vpop.eup %1415  ;;  %1427 = vrsqrt.f32 %v722_v43  ;;  %1234 = vmatprep.mubr.bf16.mxu1 %v766_v62 }
 0x173   : > { %v1418_v37 = vpop.eup %1417 }
 0x174   : > { %v1420_v29 = vpop.eup %1419  ;;  %v470_v3 = vsel %vm228_vm0, %v1414_v61, %v1418_v37 }
 0x175   : > { %v469_v14 = vsel %vm228_vm0, %v1416_v24, %v1420_v29  ;;  %v486_v17 = vmul.f32 %v478_v30, %v470_v3 }
 0x176   : > { %v485_v34 = vmul.f32 %v477_v39, %v469_v14 }
 0x178   : > { %v490_v54 = vpack.c.bf16 %v486_v17, %v485_v34 }
 0x179   : > { %v1422_v63 = vpop.eup %1421 }
 0x17a   : > { %v1424_v51 = vpop.eup %1423  ;;  %1259 = vmatmul.mubr.bf16.gmra.mrb[4].mxu0 %v490_v54 }
 0x17b   : > { %v1426_v38 = vpop.eup %1425 }
 0x17c   : > { %v1428_v27 = vpop.eup %1427  ;;  %v747_v16 = vsel %vm228_vm0, %v1422_v63, %v1426_v38 }
 0x17d   : > { %v746_v59 = vsel %vm228_vm0, %v1424_v51, %v1428_v27  ;;  %v763_v48 = vmul.f32 %v755_v0, %v747_v16 }
 0x17e   : > { %v762_v8 = vmul.f32 %v754_v60, %v746_v59 }
 0x180   : > { %v767_v56 = vpack.c.bf16 %v763_v48, %v762_v8 }
 0x182   : > { %1235 = vmatmul.mubr.bf16.gmra.mrb[4].mxu1 %v767_v56 }
 0x20d   : > { %v1256_v12 = vpop.f32.mrb[0].mxu0 }
 0x20e   : > { %v979_v45 = vpop.f32.mrb[1].mxu0 }
 0x20f   : > { %v1257_v5 = vpop.f32.mrb[2].mxu0 }
 0x210   : > { %v982_v11 = vpop.f32.mrb[3].mxu0 }
 0x215   : > { %v1232_v44 = vpop.f32.mrb[0].mxu1 }
 0x216   : > { %v988_v58 = vadd.f32 %v1256_v12, %v1232_v44  ;;  %v866_v10 = vpop.f32.mrb[1].mxu1 }
 0x217   : > { %v980_v13 = vadd.f32 %v979_v45, %v866_v10  ;;  %v1233_v4 = vpop.f32.mrb[2].mxu1 }
 0x218   : > { %v1019_v1 = vadd.f32 %v1182_v57, %v988_v58  ;;  %v991_v49 = vadd.f32 %v1257_v5, %v1233_v4  ;;  %v869_v47 = vpop.f32.mrb[3].mxu1 }
 0x219   : > { %v1017_v6 = vadd.f32 %v1182_v57, %v980_v13  ;;  %v983_v41 = vadd.f32 %v982_v11, %v869_v47 }
 0x21a   : > { %1027 = vst [vmem:[%s222_s9 + $0x10] sm:$0xff] %v1019_v1  ;;  %v1020_v36 = vadd.f32 %v1182_v57, %v991_v49 }
 0x21b   : > { %1025 = vst [vmem:[%s222_s9] sm:$0xff] %v1017_v6  ;;  %v1018_v19 = vadd.f32 %v1182_v57, %v983_v41 }
 0x21c   : > { %1028 = vst [vmem:[%s222_s9 + $0x18] sm:$0xff] %v1020_v36 }
 0x21d   : > { %1026 = vst [vmem:[%s222_s9 + $0x8] sm:$0xff] %v1018_v19 }
 0x24d   : > { %v1260_v35 = vpop.f32.mrb[4].mxu0 }
 0x24e   : > { %v995_v2 = vpop.f32.mrb[5].mxu0 }
 0x24f   : > { %v1261_v9 = vpop.f32.mrb[6].mxu0 }
 0x250   : > { %v998_v46 = vpop.f32.mrb[7].mxu0 }
 0x255   : > { %v1236_v20 = vpop.f32.mrb[4].mxu1 }
 0x256   : > { %v1004_v55 = vadd.f32 %v1260_v35, %v1236_v20  ;;  %v882_v18 = vpop.f32.mrb[5].mxu1 }
 0x257   : > { %v996_v40 = vadd.f32 %v995_v2, %v882_v18  ;;  %v1237_v31 = vpop.f32.mrb[6].mxu1 }
 0x258   : > { %v1023_v22 = vadd.f32 %v1182_v57, %v1004_v55  ;;  %v1007_v21 = vadd.f32 %v1261_v9, %v1237_v31  ;;  %v885_v28 = vpop.f32.mrb[7].mxu1 }
 0x259   : > { %v1021_v25 = vadd.f32 %v1182_v57, %v996_v40  ;;  %v999_v52 = vadd.f32 %v998_v46, %v885_v28 }
 0x25a   : > { %1031 = vst [vmem:[%s222_s9 + $0x30] sm:$0xff] %v1023_v22  ;;  %v1024_v32 = vadd.f32 %v1182_v57, %v1007_v21 }
 0x25b   : > { %1029 = vst [vmem:[%s222_s9 + $0x20] sm:$0xff] %v1021_v25  ;;  %v1022_v26 = vadd.f32 %v1182_v57, %v999_v52 }
 0x25c   : > { %1032 = vst [vmem:[%s222_s9 + $0x38] sm:$0xff] %v1024_v32 }
 0x25d   : > { %1030 = vst [vmem:[%s222_s9 + $0x28] sm:$0xff] %v1022_v26 }
 0x25e   : > { %1500 = shalt.err (!%p1497_p5)
}
 0x25f   : > { %s1501_s29 = scalar_lea.hbm %s2220_s7, 1024  ;;  %s1505_s20 = scalar_lea.hbm %s2272_s3, 2048 }
 0x260   : > { %p1502_p9 = scmp.ne.s32.totalorder %s2220_s7, %s1501_s29  ;;  %p1506_p3 = scmp.lt.u32.totalorder %s2220_s7, %s2272_s3 }
 0x261   : > { %p1507_p7 = scmp.lt.u32.totalorder %s1505_s20, %s1501_s29  ;;  %p1509_p4 = scmp.lt.u32.totalorder %s1501_s29, %s2220_s7 }
 0x262   : > { %p1503_p1 = pnand %p1502_p9, %p1700_p10 }
 0x263   : > { %p1508_p13 = por %p1507_p7, %p1506_p3 }
 0x264   : > { %p1504_p2 = pneg %p1503_p1 }
 0x265   : > { %p1510_p6 = por %p1509_p4, %p1508_p13 }
 0x267   : > { %p1511_p8 = pnand %p1510_p6, %p1504_p2 }
 0x269   : > { %1514 = shalt.err (!%p1511_p8)
}
 0x26a   : > { %s1582_s9 = smov 128   ;;  %s1583_s11 = smov 8  }
 0x26b   : > { %1276 = dma.vmem_to_hbm [thread:$0]  (%p1700_p10), %s2215_s10, 1024, %s2220_s7, %s1034_s15, %s1582_s9, %s1582_s9, %s1583_s11  }
 0x26c PF: > { %s1064_s18 = sand.u32 1, %s1553_s12   ;;  %p2290_p12 = scmp.ne.s32.totalorder %s2280_s23, 0 }
 0x26d   : > { %p2291_p11 = scmp.ge.s32.totalorder %s1573_s17, 2  ;;  %s1065_s26 = scalar_lea.sflag [#allocation4], %s1064_s18 }
 0x26f   : > { %p1287_p0 = pnand %p2291_p11, %p2290_p12 }
 0x271   : > { %1548 = dma.done.wait (!%p1287_p0), %s1065_s26, 1024  }
 0x272   : > { %1550 = vsyncadd (!%p1287_p0), %s1065_s26, 4294966272  ;;  %s20_s17 = sadd.s32 1, %s1573_s17   ;;  %s2292_s12 = smov %s1557_s13 }
 0x273   : > { %p17_p5 = scmp.ge.s32.totalorder %s20_s17, 4   ;;  %s2293_s13 = smov %s1561_s14 }
 0x274   : > { %s2294_s14 = smov %s1709_s5  ;;  %s2295_s15 = smov %s1569_s16 }
 0x275   : > { %s2296_s16 = smov %s2298_s28  ;;  %19 = sbr.rel (!%p17_p5) target bundleno = 7 (0x7), region = 82 }
 0x27c   :  { %1070 = vsyncpa [#allocation3], 1 }
 0x27d   :  { %1072 = vsyncpa [#allocation3 + $0x1], 1 }
 0x27e   :  { %1073 = vsyncpa [#allocation6], 1 }
 0x27f   :  { %1074 = vsyncpa [#allocation4], 1 }
 0x280   :  { %1076 = vsyncpa [#allocation4 + $0x1], 1 }

</bundles_post_ra>
